<compile_context>
chip_gen: v6e
topology: v6e:2x2x1
jax: 0.10.0
libtpu: 0.0.40
codegen_flags: <defaults>
</compile_context>

<pallas_src>
import jax
import jax.numpy as jnp
from jax.experimental import pallas as pl
from jax.experimental.pallas import tpu as pltpu

OUT_DIM = 10          # real number of classes
OUT_PAD = 128         # lane-dense padded logits width used *inside* the kernel
NEG_BIG = -1e30       # bias for padded logit lanes -> exp() underflows to exactly 0 in f32

TB_MAX = 4096         # max batch tile (safe for v7x 64 MiB VMEM; ~85%+ of roofline territory)
SPLIT_MIN = 1024      # if a single tile would cover the whole batch and B >= this,
                      # split into 2 tiles so both v7x TensorCores get work


def mlp_kernel(x_ref,
               w1_ref, b1_ref,
               w2_ref, b2_ref,
               w3_ref, b3_ref,
               w4_ref, b4_ref,
               w5_ref, b5_ref,
               o_ref):
    """Fused forward for one batch tile: 5 matmuls + ReLU + log_softmax (f32 math)."""

    def linear_f32(h_bf16, w_ref, b_ref):
        # bf16 x bf16 MXU matmul with f32 accumulation; bias add in f32.
        return jnp.dot(h_bf16, w_ref[...],
                       preferred_element_type=jnp.float32) + b_ref[...]

    # x arrives already in bf16; intermediates are cast to bf16 right after ReLU so
    # the (tb, width) activations the compiler materializes are half-width.
    h = x_ref[...]                                                        # (tb, 25) bf16
    h = jnp.maximum(linear_f32(h, w1_ref, b1_ref), 0.0).astype(jnp.bfloat16)  # (tb, 60)
    h = jnp.maximum(linear_f32(h, w2_ref, b2_ref), 0.0).astype(jnp.bfloat16)  # (tb, 16)
    h = jnp.maximum(linear_f32(h, w3_ref, b3_ref), 0.0).astype(jnp.bfloat16)  # (tb, 120)
    h = jnp.maximum(linear_f32(h, w4_ref, b4_ref), 0.0).astype(jnp.bfloat16)  # (tb, 84)

    logits = linear_f32(h, w5_ref, b5_ref)                                # (tb, 128) f32, padded

    # log_softmax over the padded feature axis.  Padded lanes carry a -1e30 bias
    # (and zero weight columns), so they never win the max and contribute exactly
    # 0.0 to the sum -> identical to log_softmax over the real 10 lanes.
    m = jnp.max(logits, axis=-1, keepdims=True)
    shifted = logits - m
    lse = jnp.log(jnp.sum(jnp.exp(shifted), axis=-1, keepdims=True))
    logp = shifted - lse

    # Store only the 10 real columns (f32): 12.8x less HBM writeback than the
    # padded slab and no wrapper-side column-slice pass.
    o_ref[...] = logp[:, :OUT_DIM].astype(o_ref.dtype)


def _round_up(n, m):
    return ((n + m - 1) // m) * m


def mlp_forward(x, params, *, tb=TB_MAX):
    """x: (B, 25) float32. params: f32 (in, out) weights and (1, out) biases."""
    B, D_in = x.shape
    assert D_in == 25

    # ---- batch tile selection ----
    tb = _round_up(min(max(tb, 8), TB_MAX), 8)
    B8 = _round_up(max(B, 1), 8)
    if B8 <= tb:
        if B8 >= SPLIT_MIN:
            # Large batch that would otherwise be one tile: split in two so the
            # "parallel" grid axis can shard across v7x's 2 TensorCores.
            tb = _round_up(-(-B8 // 2), 8)
        else:
            tb = B8
    num_tiles = pl.cdiv(B, tb)
    B_pad = num_tiles * tb

    # Wrapper-side zero padding of the batch to a tile multiple (rows sliced off after).
    x_p = x if B_pad == B else jnp.pad(x, ((0, B_pad - B), (0, 0)))
    x_p = x_p.astype(jnp.bfloat16)

    # bf16 weights (halve HBM/VMEM traffic), f32 biases (elementwise math stays f32).
    w1 = params["w1"].astype(jnp.bfloat16)
    w2 = params["w2"].astype(jnp.bfloat16)
    w3 = params["w3"].astype(jnp.bfloat16)
    w4 = params["w4"].astype(jnp.bfloat16)
    b1 = params["b1"].astype(jnp.float32)
    b2 = params["b2"].astype(jnp.float32)
    b3 = params["b3"].astype(jnp.float32)
    b4 = params["b4"].astype(jnp.float32)

    # Lane-dense final layer (internal only): pad W5 columns with zeros, b5 with -1e30.
    w5 = jnp.pad(params["w5"].astype(jnp.bfloat16), ((0, 0), (0, OUT_PAD - OUT_DIM)))
    b5 = jnp.pad(params["b5"].astype(jnp.float32), ((0, 0), (0, OUT_PAD - OUT_DIM)),
                 constant_values=NEG_BIG)

    def full_spec(shape):
        # Whole-array block with a constant block index: DMA'd once, stays resident
        # in VMEM across all grid steps.
        return pl.BlockSpec(shape, lambda i, _n=len(shape): (0,) * _n)

    weight_args = (w1, b1, w2, b2, w3, b3, w4, b4, w5, b5)
    weight_bytes = sum(int(a.size) * a.dtype.itemsize for a in weight_args)
    cost = pl.CostEstimate(
        flops=2 * B_pad * (25 * 60 + 60 * 16 + 16 * 120 + 120 * 84 + 84 * OUT_PAD),
        transcendentals=B_pad * (OUT_PAD + 1),
        bytes_accessed=int(x_p.size) * 2 + B_pad * OUT_DIM * 4 + weight_bytes,
    )

    out = pl.pallas_call(
        mlp_kernel,
        out_shape=jax.ShapeDtypeStruct((B_pad, OUT_DIM), jnp.float32),
        grid_spec=pltpu.PrefetchScalarGridSpec(
            num_scalar_prefetch=0,
            grid=(num_tiles,),
            in_specs=[
                pl.BlockSpec((tb, D_in), lambda i: (i, 0)),   # x tile over batch rows
                full_spec(w1.shape), full_spec(b1.shape),
                full_spec(w2.shape), full_spec(b2.shape),
                full_spec(w3.shape), full_spec(b3.shape),
                full_spec(w4.shape), full_spec(b4.shape),
                full_spec(w5.shape), full_spec(b5.shape),
            ],
            # Narrow output: last dim 10 == full array dim (legal); tb is a multiple of 8.
            out_specs=pl.BlockSpec((tb, OUT_DIM), lambda i: (i, 0)),
        ),
        compiler_params=pltpu.CompilerParams(
            dimension_semantics=("parallel",),     # shards batch tiles across v7x's 2 TCs
            vmem_limit_bytes=48 * 1024 * 1024,     # > 32 MiB default, < v7x 64 MiB physical
        ),
        cost_estimate=cost,
    )(x_p, *weight_args)

    return out if B_pad == B else out[:B]


def init_params(key):
    """PyTorch nn.Linear-style init (U[-1/sqrt(fan_in), +1/sqrt(fan_in)]).
    Weights stored transposed as (in_features, out_features)."""
    dims = [(25, 60), (60, 16), (16, 120), (120, 84), (84, 10)]
    params = {}
    keys = jax.random.split(key, 2 * len(dims))
    for idx, (fan_in, fan_out) in enumerate(dims):
        bound = 1.0 / (fan_in ** 0.5)
        wk, bk = keys[2 * idx], keys[2 * idx + 1]
        params[f"w{idx + 1}"] = jax.random.uniform(
            wk, (fan_in, fan_out), jnp.float32, minval=-bound, maxval=bound)
        params[f"b{idx + 1}"] = jax.random.uniform(
            bk, (1, fan_out), jnp.float32, minval=-bound, maxval=bound)
    return params


def mlp_reference(x, params):
    """Pure-JAX reference with the same bf16-input / f32-accumulate precision path."""
    h = x.astype(jnp.bfloat16)
    for i in range(1, 5):
        wi = params[f"w{i}"].astype(jnp.bfloat16)
        bi = params[f"b{i}"].astype(jnp.float32)
        h = jnp.maximum(
            jnp.dot(h, wi, preferred_element_type=jnp.float32) + bi, 0.0)
        h = h.astype(jnp.bfloat16)
    logits = jnp.dot(h, params["w5"].astype(jnp.bfloat16),
                     preferred_element_type=jnp.float32) + params["b5"].astype(jnp.float32)
    return jax.nn.log_softmax(logits, axis=1)


if __name__ == "__main__":
    key = jax.random.PRNGKey(0)
    pkey, xkey, xkey2 = jax.random.split(key, 3)

    params = init_params(pkey)

    # Small primary test (matches the module's (B, 25) -> (B, 10) forward).
    B = 8
    x = jax.random.normal(xkey, (B, 25), jnp.float32)
    out = jax.block_until_ready(mlp_forward(x, params))
    ref = mlp_reference(x, params)
    assert out.shape == (B, OUT_DIM), out.shape
    assert bool(jnp.all(jnp.isfinite(out)))
    assert jnp.allclose(out, ref, atol=1e-3, rtol=1e-3), float(jnp.max(jnp.abs(out - ref)))

    # Secondary check: non-multiple-of-8 batch exercises the padding + row-slice path.
    B2 = 300
    x2 = jax.random.normal(xkey2, (B2, 25), jnp.float32)
    out2 = jax.block_until_ready(mlp_forward(x2, params))
    ref2 = mlp_reference(x2, params)
    assert out2.shape == (B2, OUT_DIM), out2.shape
    assert bool(jnp.all(jnp.isfinite(out2)))
    assert jnp.allclose(out2, ref2, atol=1e-3, rtol=1e-3), float(jnp.max(jnp.abs(out2 - ref2)))

    print("KERNEL_OK")
</pallas_src>

<mosaic_0001>
module attributes {stable_mosaic.version = 11 : i64} {
  func.func @mlp_kernel(%arg0: i32, %arg1: memref<8x25xbf16, #tpu.memory_space<vmem>>, %arg2: memref<25x60xbf16, #tpu.memory_space<vmem>>, %arg3: memref<1x60xf32, #tpu.memory_space<vmem>>, %arg4: memref<60x16xbf16, #tpu.memory_space<vmem>>, %arg5: memref<1x16xf32, #tpu.memory_space<vmem>>, %arg6: memref<16x120xbf16, #tpu.memory_space<vmem>>, %arg7: memref<1x120xf32, #tpu.memory_space<vmem>>, %arg8: memref<120x84xbf16, #tpu.memory_space<vmem>>, %arg9: memref<1x84xf32, #tpu.memory_space<vmem>>, %arg10: memref<84x128xbf16, #tpu.memory_space<vmem>>, %arg11: memref<1x128xf32, #tpu.memory_space<vmem>>, %arg12: memref<8x10xf32, #tpu.memory_space<vmem>>) attributes {dimension_semantics = [#tpu.dimension_semantics<parallel>], iteration_bounds = array<i64: 1>, scalar_prefetch = 0 : i64, scratch_operands = 0 : i64, tpu.core_type = #tpu.core_type<tc>, window_params = [{transform_indices = @transform_0, window_bounds = array<i64: 8, 25>}, {pipeline_mode = #tpu.pipeline_mode<synchronous>, transform_indices = @transform_1, window_bounds = array<i64: 25, 60>}, {pipeline_mode = #tpu.pipeline_mode<synchronous>, transform_indices = @transform_2, window_bounds = array<i64: 1, 60>}, {pipeline_mode = #tpu.pipeline_mode<synchronous>, transform_indices = @transform_3, window_bounds = array<i64: 60, 16>}, {pipeline_mode = #tpu.pipeline_mode<synchronous>, transform_indices = @transform_4, window_bounds = array<i64: 1, 16>}, {pipeline_mode = #tpu.pipeline_mode<synchronous>, transform_indices = @transform_5, window_bounds = array<i64: 16, 120>}, {pipeline_mode = #tpu.pipeline_mode<synchronous>, transform_indices = @transform_6, window_bounds = array<i64: 1, 120>}, {pipeline_mode = #tpu.pipeline_mode<synchronous>, transform_indices = @transform_7, window_bounds = array<i64: 120, 84>}, {pipeline_mode = #tpu.pipeline_mode<synchronous>, transform_indices = @transform_8, window_bounds = array<i64: 1, 84>}, {pipeline_mode = #tpu.pipeline_mode<synchronous>, transform_indices = @transform_9, window_bounds = array<i64: 84, 128>}, {pipeline_mode = #tpu.pipeline_mode<synchronous>, transform_indices = @transform_10, window_bounds = array<i64: 1, 128>}, {transform_indices = @transform_11, window_bounds = array<i64: 8, 10>}]} {
    %c0 = arith.constant 0 : index
    %c0_0 = arith.constant 0 : index
    %0 = vector.load %arg1[%c0, %c0_0] : memref<8x25xbf16, #tpu.memory_space<vmem>>, vector<8x25xbf16>
    %c0_1 = arith.constant 0 : index
    %c0_2 = arith.constant 0 : index
    %1 = vector.load %arg2[%c0_1, %c0_2] : memref<25x60xbf16, #tpu.memory_space<vmem>>, vector<25x60xbf16>
    %cst = arith.constant dense<0.000000e+00> : vector<8x60xf32>
    %2 = tpu.matmul %0, %1, %cst {dimension_numbers = #tpu.dot_dimension_numbers<[1], [0], [0], [1], [0, 0, 1, 1], [], []>} : vector<8x25xbf16>, vector<25x60xbf16>, vector<8x60xf32> -> vector<8x60xf32>
    %c0_3 = arith.constant 0 : index
    %c0_4 = arith.constant 0 : index
    %3 = vector.load %arg3[%c0_3, %c0_4] : memref<1x60xf32, #tpu.memory_space<vmem>>, vector<1x60xf32>
    %4 = vector.broadcast %3 : vector<1x60xf32> to vector<8x60xf32>
    %5 = arith.addf %2, %4 : vector<8x60xf32>
    %cst_5 = arith.constant 0.000000e+00 : f32
    %6 = vector.broadcast %cst_5 : f32 to vector<8x60xf32>
    %7 = arith.maximumf %5, %6 : vector<8x60xf32>
    %8 = arith.truncf %7 : vector<8x60xf32> to vector<8x60xbf16>
    %c0_6 = arith.constant 0 : index
    %c0_7 = arith.constant 0 : index
    %9 = vector.load %arg4[%c0_6, %c0_7] : memref<60x16xbf16, #tpu.memory_space<vmem>>, vector<60x16xbf16>
    %cst_8 = arith.constant dense<0.000000e+00> : vector<8x16xf32>
    %10 = tpu.matmul %8, %9, %cst_8 {dimension_numbers = #tpu.dot_dimension_numbers<[1], [0], [0], [1], [0, 0, 1, 1], [], []>} : vector<8x60xbf16>, vector<60x16xbf16>, vector<8x16xf32> -> vector<8x16xf32>
    %c0_9 = arith.constant 0 : index
    %c0_10 = arith.constant 0 : index
    %11 = vector.load %arg5[%c0_9, %c0_10] : memref<1x16xf32, #tpu.memory_space<vmem>>, vector<1x16xf32>
    %12 = vector.broadcast %11 : vector<1x16xf32> to vector<8x16xf32>
    %13 = arith.addf %10, %12 : vector<8x16xf32>
    %cst_11 = arith.constant 0.000000e+00 : f32
    %14 = vector.broadcast %cst_11 : f32 to vector<8x16xf32>
    %15 = arith.maximumf %13, %14 : vector<8x16xf32>
    %16 = arith.truncf %15 : vector<8x16xf32> to vector<8x16xbf16>
    %c0_12 = arith.constant 0 : index
    %c0_13 = arith.constant 0 : index
    %17 = vector.load %arg6[%c0_12, %c0_13] : memref<16x120xbf16, #tpu.memory_space<vmem>>, vector<16x120xbf16>
    %cst_14 = arith.constant dense<0.000000e+00> : vector<8x120xf32>
    %18 = tpu.matmul %16, %17, %cst_14 {dimension_numbers = #tpu.dot_dimension_numbers<[1], [0], [0], [1], [0, 0, 1, 1], [], []>} : vector<8x16xbf16>, vector<16x120xbf16>, vector<8x120xf32> -> vector<8x120xf32>
    %c0_15 = arith.constant 0 : index
    %c0_16 = arith.constant 0 : index
    %19 = vector.load %arg7[%c0_15, %c0_16] : memref<1x120xf32, #tpu.memory_space<vmem>>, vector<1x120xf32>
    %20 = vector.broadcast %19 : vector<1x120xf32> to vector<8x120xf32>
    %21 = arith.addf %18, %20 : vector<8x120xf32>
    %cst_17 = arith.constant 0.000000e+00 : f32
    %22 = vector.broadcast %cst_17 : f32 to vector<8x120xf32>
    %23 = arith.maximumf %21, %22 : vector<8x120xf32>
    %24 = arith.truncf %23 : vector<8x120xf32> to vector<8x120xbf16>
    %c0_18 = arith.constant 0 : index
    %c0_19 = arith.constant 0 : index
    %25 = vector.load %arg8[%c0_18, %c0_19] : memref<120x84xbf16, #tpu.memory_space<vmem>>, vector<120x84xbf16>
    %cst_20 = arith.constant dense<0.000000e+00> : vector<8x84xf32>
    %26 = tpu.matmul %24, %25, %cst_20 {dimension_numbers = #tpu.dot_dimension_numbers<[1], [0], [0], [1], [0, 0, 1, 1], [], []>} : vector<8x120xbf16>, vector<120x84xbf16>, vector<8x84xf32> -> vector<8x84xf32>
    %c0_21 = arith.constant 0 : index
    %c0_22 = arith.constant 0 : index
    %27 = vector.load %arg9[%c0_21, %c0_22] : memref<1x84xf32, #tpu.memory_space<vmem>>, vector<1x84xf32>
    %28 = vector.broadcast %27 : vector<1x84xf32> to vector<8x84xf32>
    %29 = arith.addf %26, %28 : vector<8x84xf32>
    %cst_23 = arith.constant 0.000000e+00 : f32
    %30 = vector.broadcast %cst_23 : f32 to vector<8x84xf32>
    %31 = arith.maximumf %29, %30 : vector<8x84xf32>
    %32 = arith.truncf %31 : vector<8x84xf32> to vector<8x84xbf16>
    %c0_24 = arith.constant 0 : index
    %c0_25 = arith.constant 0 : index
    %33 = vector.load %arg10[%c0_24, %c0_25] : memref<84x128xbf16, #tpu.memory_space<vmem>>, vector<84x128xbf16>
    %cst_26 = arith.constant dense<0.000000e+00> : vector<8x128xf32>
    %34 = tpu.matmul %32, %33, %cst_26 {dimension_numbers = #tpu.dot_dimension_numbers<[1], [0], [0], [1], [0, 0, 1, 1], [], []>} : vector<8x84xbf16>, vector<84x128xbf16>, vector<8x128xf32> -> vector<8x128xf32>
    %c0_27 = arith.constant 0 : index
    %c0_28 = arith.constant 0 : index
    %35 = vector.load %arg11[%c0_27, %c0_28] : memref<1x128xf32, #tpu.memory_space<vmem>>, vector<1x128xf32>
    %36 = vector.broadcast %35 : vector<1x128xf32> to vector<8x128xf32>
    %37 = arith.addf %34, %36 : vector<8x128xf32>
    %cst_29 = arith.constant dense<0xFF800000> : vector<8xf32>
    %38 = vector.multi_reduction <maximumf>, %37, %cst_29 [1] : vector<8x128xf32> to vector<8xf32>
    %39 = vector.shape_cast %38 : vector<8xf32> to vector<8x1xf32>
    %40 = vector.broadcast %39 : vector<8x1xf32> to vector<8x128xf32>
    %41 = arith.subf %37, %40 : vector<8x128xf32>
    %42 = math.exp %41 : vector<8x128xf32>
    %cst_30 = arith.constant dense<0.000000e+00> : vector<8xf32>
    %43 = vector.multi_reduction <add>, %42, %cst_30 [1] : vector<8x128xf32> to vector<8xf32>
    %44 = vector.shape_cast %43 : vector<8xf32> to vector<8x1xf32>
    %45 = math.log %44 : vector<8x1xf32>
    %46 = vector.broadcast %45 : vector<8x1xf32> to vector<8x128xf32>
    %47 = arith.subf %41, %46 : vector<8x128xf32>
    %48 = vector.extract_strided_slice %47 {offsets = [0, 0], sizes = [8, 10], strides = [1, 1]} : vector<8x128xf32> to vector<8x10xf32>
    %c0_31 = arith.constant 0 : index
    %c0_32 = arith.constant 0 : index
    %49 = vector.load %arg12[%c0_31, %c0_32] : memref<8x10xf32, #tpu.memory_space<vmem>>, vector<8x10xf32>
    tpu.vector_store %arg12[%c0_31, %c0_32], %48 {strides = array<i32>} : memref<8x10xf32, #tpu.memory_space<vmem>>, vector<8x10xf32>,
    return
  }
  func.func @transform_0(%arg0: i32) -> (i32, i32) {
    %c0_i32 = arith.constant 0 : i32
    %c0_i32_0 = arith.constant 0 : i32
    return %arg0, %c0_i32 : i32, i32
  }
  func.func @transform_1(%arg0: i32) -> (i32, i32) {
    %c0_i32 = arith.constant 0 : i32
    %c0_i32_0 = arith.constant 0 : i32
    %c0_i32_1 = arith.constant 0 : i32
    return %c0_i32, %c0_i32_0 : i32, i32
  }
  func.func @transform_2(%arg0: i32) -> (i32, i32) {
    %c0_i32 = arith.constant 0 : i32
    %c0_i32_0 = arith.constant 0 : i32
    %c0_i32_1 = arith.constant 0 : i32
    return %c0_i32, %c0_i32_0 : i32, i32
  }
  func.func @transform_3(%arg0: i32) -> (i32, i32) {
    %c0_i32 = arith.constant 0 : i32
    %c0_i32_0 = arith.constant 0 : i32
    %c0_i32_1 = arith.constant 0 : i32
    return %c0_i32, %c0_i32_0 : i32, i32
  }
  func.func @transform_4(%arg0: i32) -> (i32, i32) {
    %c0_i32 = arith.constant 0 : i32
    %c0_i32_0 = arith.constant 0 : i32
    %c0_i32_1 = arith.constant 0 : i32
    return %c0_i32, %c0_i32_0 : i32, i32
  }
  func.func @transform_5(%arg0: i32) -> (i32, i32) {
    %c0_i32 = arith.constant 0 : i32
    %c0_i32_0 = arith.constant 0 : i32
    %c0_i32_1 = arith.constant 0 : i32
    return %c0_i32, %c0_i32_0 : i32, i32
  }
  func.func @transform_6(%arg0: i32) -> (i32, i32) {
    %c0_i32 = arith.constant 0 : i32
    %c0_i32_0 = arith.constant 0 : i32
    %c0_i32_1 = arith.constant 0 : i32
    return %c0_i32, %c0_i32_0 : i32, i32
  }
  func.func @transform_7(%arg0: i32) -> (i32, i32) {
    %c0_i32 = arith.constant 0 : i32
    %c0_i32_0 = arith.constant 0 : i32
    %c0_i32_1 = arith.constant 0 : i32
    return %c0_i32, %c0_i32_0 : i32, i32
  }
  func.func @transform_8(%arg0: i32) -> (i32, i32) {
    %c0_i32 = arith.constant 0 : i32
    %c0_i32_0 = arith.constant 0 : i32
    %c0_i32_1 = arith.constant 0 : i32
    return %c0_i32, %c0_i32_0 : i32, i32
  }
  func.func @transform_9(%arg0: i32) -> (i32, i32) {
    %c0_i32 = arith.constant 0 : i32
    %c0_i32_0 = arith.constant 0 : i32
    %c0_i32_1 = arith.constant 0 : i32
    return %c0_i32, %c0_i32_0 : i32, i32
  }
  func.func @transform_10(%arg0: i32) -> (i32, i32) {
    %c0_i32 = arith.constant 0 : i32
    %c0_i32_0 = arith.constant 0 : i32
    %c0_i32_1 = arith.constant 0 : i32
    return %c0_i32, %c0_i32_0 : i32, i32
  }
  func.func @transform_11(%arg0: i32) -> (i32, i32) {
    %c0_i32 = arith.constant 0 : i32
    %c0_i32_0 = arith.constant 0 : i32
    return %arg0, %c0_i32 : i32, i32
  }
}

</mosaic_0001>

<bundles_post_ra>
// kernel: tpu_custom_call.1
= control target key start
LH: loop header
LB: loop body
LE: loop exit
PB: predicated region body
PF: predicated region fallthrough
CT: control target
= control target key end

     0   :  { %vm67_vm0 = vcmask 1043456   ;;  %v676_v0 = vmov 0.0   ;;  %vm68_vm1 = vcmask 1044480   ;;  %v677_v2 = vmov 65535   ;;  %s857_s0 = inlined_call_operand.vmem [shape: bf16[8,25], index: 0, kind: input, shape index: {}]   ;;  %s858_s1 = inlined_call_operand.vmem [shape: bf16[25,60], index: 1, kind: input, shape index: {}]   ;;  %s859_s2 = inlined_call_operand.vmem [shape: f32[1,60], index: 2, kind: input, shape index: {}]   ;;  %s860_s3 = inlined_call_operand.vmem [shape: bf16[60,16], index: 3, kind: input, shape index: {}]   ;;  %s861_s4 = inlined_call_operand.vmem [shape: f32[1,16], index: 4, kind: input, shape index: {}]   ;;  %s862_s5 = inlined_call_operand.vmem [shape: bf16[16,120], index: 5, kind: input, shape index: {}]   ;;  %s863_s6 = inlined_call_operand.vmem [shape: f32[1,120], index: 6, kind: input, shape index: {}]   ;;  %s864_s7 = inlined_call_operand.vmem [shape: bf16[120,84], index: 7, kind: input, shape index: {}]   ;;  %s865_s8 = inlined_call_operand.vmem [shape: f32[1,84], index: 8, kind: input, shape index: {}]   ;;  %s866_s9 = inlined_call_operand.vmem [shape: bf16[84,128], index: 9, kind: input, shape index: {}]   ;;  %s867_s10 = inlined_call_operand.vmem [shape: f32[1,128], index: 10, kind: input, shape index: {}]   ;;  %s868_s11 = inlined_call_operand.hbm [shape: f32[8,10], index: 11, kind: output, shape index: {}]  }
   0x1   :  { %563 = vmatprep.subr.bf16.mxu0 %v676_v0  ;;  %v629_v1 = vld [vmem:[%s858_s1 + $0x8] sm:$0x1f]   ;;  %571 = vmatprep.subr.bf16.mxu1 %v676_v0  ;;  %v69_v3 = vsel %vm67_vm0, 4294967295, %v677_v2  ;;  %vm678_vm2 = vmmov 0   ;;  %vm158_vm3 = vcmask 1045504   ;;  %v630_v7 = vld [vmem:[%s858_s1] sm:$0xff]  }
   0x2   :  { %v70_v4 = vsel %vm68_vm1, %v69_v3, 0  ;;  %567 = vmatprep.mubr.msk.bf16.mxu0 %vm678_vm2, %v676_v0  ;;  %579 = vmatprep.mubr.msk.bf16.mxu1 %vm678_vm2, %v676_v0  ;;  %v631_v6 = vld [vmem:[%s860_s3 + $0x18] sm:$0x3f]   ;;  %vm63_vm4 = vcmask 203776   ;;  %v632_v9 = vld [vmem:[%s860_s3 + $0x10] sm:$0xff]  }
   0x3   :  { %v72_v5 = vand.u32 %v629_v1, %v70_v4  ;;  %v160_v8 = vsel %vm158_vm3, %v631_v6, 0  ;;  %v40_v10 = vld [vmem:[%s857_s0] sm:$0xf] }
   0x4   :  { %572 = vmatpush3.bf16.msra.mxu1 %v160_v8 }
   0x5   :  { %564 = vmatpush3.bf16.msra.mxu0 %v72_v5  ;;  %573 = vmatprep.subr.bf16.mxu1 %v676_v0 }
   0x6   :  { %565 = vmatprep.subr.bf16.mxu0 %v676_v0 }
   0x8   :  { %574 = vmatpush3.bf16.msra.mxu1 %v632_v9 }
   0x9   :  { %566 = vmatpush3.bf16.msra.mxu0 %v630_v7  ;;  %575 = vmatprep.subr.bf16.mxu1 %v676_v0 }
   0xa   :  { %583 = vmatprep.subr.bf16.mxu0 %v676_v0 }
   0xc   :  { %568 = vmatmul.mubr.msk.bf16.vlgmr.msra.gmra.mxu0 %vm63_vm4, %v40_v10 }
   0xd   :  { %585 = vmatprep.mubr.msk.bf16.mxu0 %vm678_vm2, %v676_v0 }
   0xe   :  { %16 = vsyncpa [#allocation3], 0  ;;  %v633_v11 = vld [vmem:[%s860_s3 + $0x8] sm:$0xff]   ;;  %v634_v12 = vld [vmem:[%s860_s3] sm:$0xff]   ;;  %vm154_vm5 = vcmask 490496   ;;  %vm219_vm6 = vcmask 130048  }
   0xf   :  { %576 = vmatpush3.bf16.msra.mxu1 %v633_v11  ;;  %v635_v13 = vld [vmem:[%s862_s5] sm:$0xff]   ;;  %v636_v25 = vld [vmem:[%s864_s7 + $0x38] ss:$0 sps:$4 sm:$0xff]   ;;  %v637_v32 = vld [vmem:[%s864_s7 + $0x30] sm:$0xff]   ;;  %vm436_vm7 = vcmask 1041408   ;;  %vm332_vm8 = vcmask 982016  }
  0x10   :  { %577 = vmatprep.subr.bf16.mxu1 %v676_v0  ;;  %584 = vmatpush3.bf16.msra.mxu0 %v635_v13  ;;  %v506_v14 = vld [vmem:[%s859_s2] ss:$0 sm:$0xff]  ;;  %v337_v30 = vsel %vm67_vm0, %v636_v25, 0  ;;  %v638_v33 = vld [vmem:[%s864_s7 + $0x28] sm:$0xff]   ;;  %v640_v35 = vld [vmem:[%s864_s7 + $0x18] sm:$0xff]   ;;  %vm432_vm9 = vcmask 687104  }
  0x11   :  { %589 = vmatprep.subr.bf16.mxu0 %v676_v0  ;;  %v510_v22 = vld [vmem:[%s861_s4] ss:$0 sm:$0xff]  ;;  %v641_v36 = vld [vmem:[%s864_s7 + $0x10] sm:$0xff]   ;;  %v642_v37 = vld [vmem:[%s864_s7 + $0x8] sm:$0xff]   ;;  %vm490_vm10 = vcmask 80896  }
  0x12   :  { %v639_v34 = vld [vmem:[%s864_s7 + $0x20] sm:$0xff]   ;;  %v644_v39 = vld [vmem:[%s866_s9 + $0x28] ss:$0 sps:$4 sm:$0x33]   ;;  %v646_v42 = vld [vmem:[%s866_s9 + $0x18] sm:$0xff]  }
  0x13   :  { %578 = vmatpush3.bf16.msra.mxu1 %v634_v12  ;;  %v643_v38 = vld [vmem:[%s864_s7] sm:$0xff]   ;;  %v438_v40 = vsel %vm436_vm7, %v644_v39, 0  ;;  %v647_v43 = vld [vmem:[%s866_s9 + $0x10] sm:$0xff]   ;;  %v648_v52 = vld [vmem:[%s866_s9 + $0x8] sm:$0xff]  }
  0x14   :  { %609 = vmatprep.subr.bf16.mxu1 %v676_v0  ;;  %v645_v41 = vld [vmem:[%s866_s9 + $0x20] sm:$0xff]  }
  0x15   :  { %v516_v44 = vld [vmem:[%s863_s6] ss:$0 sm:$0xff] }
  0x16   :  { %v649_v53 = vld [vmem:[%s866_s9] sm:$0xff]  }
  0x17   :  { %v519_v54 = vld [vmem:[%s865_s8] ss:$0 sm:$0xff]  ;;  %s679_s8 = smov [#allocation2]  }
  0x18   :  { %v529_v62 = vld [vmem:[%s867_s10] ss:$0 sm:$0xff]  ;;  %s498_s9 = sshll.u32 %s679_s8, 4  ;;  %s499_s9 = int_to_ptr.vmem [resolvable:$true] %s498_s9 }
  0x19   :  { %s654_s10 = scalar_lea.vmem %s499_s9, 128  ;;  %p659_p1 = scmp.lt.s32.totalorder %s499_s9, %s499_s9 }
  0x1a   :  { %p655_p0 = scmp.ne.s32.totalorder %s499_s9, %s654_s10  ;;  %p660_p2 = scmp.lt.s32.totalorder %s654_s10, %s654_s10 }
  0x1c   :  { %p661_p3 = por %p660_p2, %p659_p1 }
  0x1e   :  { %p662_p4 = pnand %p661_p3, %p655_p0 }
  0xcc   :  { %v108_v15 = vpop.f32.mrf.mxu0 }
  0xcd   :  { %v109_v16 = vadd.f32 %v506_v14, %v108_v15 }
  0xce   :  { %v569_v17 = vpop.f32.mrf.mxu0 }
  0xcf   :  { %v114_v18 = vmax.f32 %v109_v16, 0.0 }
  0xd0   :  { %v111_v19 = vpop.f32.mrf.mxu0 }
  0xd1   :  { %v115_v20 = vpack.c.bf16 %v114_v18, %v114_v18 }
  0xd2   :  { %v570_v21 = vpop.f32.mrf.mxu0 }
  0xd3   :  { %580 = vmatmul.mubr.msk.bf16.vlgmr.msra.gmra.mxu1 %vm154_vm5, %v115_v20 }
  0xd4   :  { %621 = vmatprep.mubr.msk.bf16.mxu1 %vm678_vm2, %v676_v0  ;;  %610 = vmatpush3.bf16.msra.mxu1 %v438_v40 }
  0xd5   :  { %611 = vmatprep.subr.bf16.mxu1 %v676_v0 }
  0xd8   :  { %612 = vmatpush3.bf16.msra.mxu1 %v645_v41 }
  0xd9   :  { %613 = vmatprep.subr.bf16.mxu1 %v676_v0 }
  0xdc   :  { %614 = vmatpush3.bf16.msra.mxu1 %v646_v42 }
  0xdd   :  { %615 = vmatprep.subr.bf16.mxu1 %v676_v0 }
  0xe0   :  { %616 = vmatpush3.bf16.msra.mxu1 %v647_v43 }
  0xe1   :  { %617 = vmatprep.subr.bf16.mxu1 %v676_v0 }
  0xe4   :  { %618 = vmatpush3.bf16.msra.mxu1 %v648_v52 }
  0xe5   :  { %619 = vmatprep.subr.bf16.mxu1 %v676_v0 }
  0xe8   :  { %620 = vmatpush3.bf16.msra.mxu1 %v649_v53 }
 0x193   :  { %v196_v23 = vpop.f32.mrf.mxu1 }
 0x194   :  { %v197_v24 = vadd.f32 %v510_v22, %v196_v23 }
 0x195   :  { %v581_v26 = vpop.f32.mrf.mxu1 }
 0x196   :  { %v202_v27 = vmax.f32 %v197_v24, 0.0 }
 0x197   :  { %v199_v28 = vpop.f32.mrf.mxu1 }
 0x198   :  { %v203_v29 = vpack.c.bf16 %v202_v27, %v202_v27 }
 0x199   :  { %v582_v31 = vpop.f32.mrf.mxu1 }
 0x19a   :  { %586 = vmatmul.mubr.msk.bf16.vlgmr.msra.gmra.mxu0 %vm219_vm6, %v203_v29 }
 0x19b   :  { %590 = vmatpush3.bf16.msra.mxu0 %v337_v30  ;;  %605 = vmatprep.mubr.msk.bf16.mxu0 %vm678_vm2, %v676_v0 }
 0x19c   :  { %591 = vmatprep.subr.bf16.mxu0 %v676_v0 }
 0x19f   :  { %592 = vmatpush3.bf16.msra.mxu0 %v637_v32 }
 0x1a0   :  { %593 = vmatprep.subr.bf16.mxu0 %v676_v0 }
 0x1a3   :  { %594 = vmatpush3.bf16.msra.mxu0 %v638_v33 }
 0x1a4   :  { %595 = vmatprep.subr.bf16.mxu0 %v676_v0 }
 0x1a7   :  { %596 = vmatpush3.bf16.msra.mxu0 %v639_v34 }
 0x1a8   :  { %597 = vmatprep.subr.bf16.mxu0 %v676_v0 }
 0x1ab   :  { %598 = vmatpush3.bf16.msra.mxu0 %v640_v35 }
 0x1ac   :  { %599 = vmatprep.subr.bf16.mxu0 %v676_v0 }
 0x1af   :  { %600 = vmatpush3.bf16.msra.mxu0 %v641_v36 }
 0x1b0   :  { %601 = vmatprep.subr.bf16.mxu0 %v676_v0 }
 0x1b3   :  { %602 = vmatpush3.bf16.msra.mxu0 %v642_v37 }
 0x1b4   :  { %603 = vmatprep.subr.bf16.mxu0 %v676_v0 }
 0x1b7   :  { %604 = vmatpush3.bf16.msra.mxu0 %v643_v38 }
 0x25a   :  { %v257_v45 = vpop.f32.mrf.mxu0 }
 0x25b   :  { %v258_v46 = vadd.f32 %v516_v44, %v257_v45 }
 0x25c   :  { %v587_v47 = vpop.f32.mrf.mxu0 }
 0x25d   :  { %v263_v48 = vmax.f32 %v258_v46, 0.0 }
 0x25e   :  { %v260_v49 = vpop.f32.mrf.mxu0 }
 0x25f   :  { %v264_v50 = vpack.c.bf16 %v263_v48, %v263_v48 }
 0x260   :  { %v588_v51 = vpop.f32.mrf.mxu0 }
 0x261   :  { %606 = vmatmul.mubr.msk.bf16.vlgmr.msra.gmra.mxu0 %vm332_vm8, %v264_v50 }
 0x321   :  { %v373_v55 = vpop.f32.mrf.mxu0 }
 0x322   :  { %v374_v56 = vadd.f32 %v519_v54, %v373_v55 }
 0x323   :  { %v607_v57 = vpop.f32.mrf.mxu0 }
 0x324   :  { %v379_v58 = vmax.f32 %v374_v56, 0.0 }
 0x325   :  { %v376_v59 = vpop.f32.mrf.mxu0 }
 0x326   :  { %v380_v60 = vpack.c.bf16 %v379_v58, %v379_v58 }
 0x327   :  { %v608_v61 = vpop.f32.mrf.mxu0 }
 0x328   :  { %622 = vmatmul.mubr.msk.bf16.vlgmr.msra.gmra.mxu1 %vm432_vm9, %v380_v60 }
 0x3e8   :  { %v474_v63 = vpop.f32.mrf.mxu1 }
 0x3e9   :  { %v475_v0 = vadd.f32 %v529_v62, %v474_v63 }
 0x3ea   :  { %v623_v1 = vpop.f32.mrf.mxu1 }
 0x3eb   :  { %480 = vmax.xlane.f32.xlu0 %v475_v0 }
 0x3ec   :  { %v477_v2 = vpop.f32.mrf.mxu1 }
 0x3ee   :  { %v624_v3 = vpop.f32.mrf.mxu1 }
 0x474   :  { %v481_v4 = vpop.xlane.xlu0 %480 }
 0x475   :  { %v482_v5 = vsub.f32 %v475_v0, %v481_v4 }
 0x477   :  { %v483_v6 = vmul.f32 1.442695, %v482_v5 }
 0x479   :  { %650 = vpow2.f32 %v483_v6 }
 0x486   :  { %v651_v7 = vpop.eup %650 }
 0x487   :  { %485 = vadd.xlane.f32.xlu0 %v651_v7 }
 0x510   :  { %v486_v8 = vpop.xlane.xlu0 %485 }
 0x511   :  { %652 = vlog2.f32 %v486_v8 }
 0x51e   :  { %v653_v9 = vpop.eup %652 }
 0x51f   :  { %v488_v10 = vmul.f32 0.6931472, %v653_v9 }
 0x521   :  { %v489_v11 = vsub.f32 %v482_v5, %v488_v10 }
 0x523   :  { %491 = vst.msk [vmem:[#allocation2] sm:$0xff] %vm490_vm10, %v489_v11 }
 0x524   :  { %665 = shalt.err (!%p662_p4)
}
 0x525   :  { %501 = dma.vmem_to_hbm [thread:$0]  %s499_s9, 128, %s868_s11, [#allocation3]  }
 0x526   :  { %674 = dma.done.wait [#allocation3], 128  }
 0x527   :  { %675 = vsyncadd [#allocation3], 4294967168 }
 0x528   :  { %505 = vsyncpa [#allocation3], 1 }

</bundles_post_ra>
